<compile_context>
chip_gen: v5e
topology: v5e:2x2
jax: 0.10.0
libtpu: 0.0.40
codegen_flags: <defaults>
</compile_context>

<pallas_src>
import functools

import jax
import jax.numpy as jnp
from jax import lax
from jax.experimental import pallas as pl
from jax.experimental.pallas import tpu as pltpu


def _rup(x, m):
    return ((x + m - 1) // m) * m


def _pad_to(x, shape):
    return jnp.pad(x, [(0, s - d) for d, s in zip(x.shape, shape)])


def _content_attn_kernel(scaling, a_chunk, n_chunks, tanh_bf16,
                         len_ref,     # [BB, 1]  int32
                         enc_ref,     # [BB, T, E]   (md = bf16 or f32)
                         dec_ref,     # [BB, D]      md
                         w_enc_ref,   # [E, A]       md
                         w_dec_ref,   # [D, A]       md
                         b_ea_ref,    # [1, A]  f32  (b_enc + b_dec folded)
                         w_attn_ref,  # [1, A]  f32
                         w_out_ref,   # [E, O]       md
                         b_out_ref,   # [1, O]  f32
                         ctx_ref,     # [BB, O] f32
                         attn_ref):   # [BB, T] f32
    BB, T, E = enc_ref.shape

    enc = enc_ref[...]                                   # [BB, T, E]
    dec = dec_ref[...]                                   # [BB, D]
    enc2d = enc.reshape(BB * T, E)                       # layout-preserving collapse

    # --- additive score, chunked over A so the f32 intermediate is [BB,T,a_chunk]
    e = jnp.zeros((BB, T), jnp.float32)
    for c in range(n_chunks):                            # static, tiny trip count
        a0 = c * a_chunk
        w_enc_c = w_enc_ref[:, a0:a0 + a_chunk]          # [E, Ac]  (static ref slice)
        w_dec_c = w_dec_ref[:, a0:a0 + a_chunk]          # [D, Ac]
        b_c = b_ea_ref[:, a0:a0 + a_chunk]               # [1, Ac] f32
        w_attn_c = w_attn_ref[:, a0:a0 + a_chunk]        # [1, Ac] f32

        enc_h = jnp.dot(enc2d, w_enc_c,
                        preferred_element_type=jnp.float32).reshape(BB, T, a_chunk)
        dec_h = jnp.dot(dec, w_dec_c,
                        preferred_element_type=jnp.float32) + b_c       # [BB, Ac]
        z = enc_h + dec_h[:, None, :]                                   # [BB, T, Ac]
        if tanh_bf16:
            s = jnp.tanh(z.astype(jnp.bfloat16)).astype(jnp.float32)    # EUP bf16
        else:
            s = jnp.tanh(z)
        # Padded A columns have w_enc = b = w_attn = 0 -> contribute exactly 0.
        e = e + jnp.sum(s * w_attn_c[None, :, :], axis=-1)              # [BB, T]

    # --- length mask THEN scale (matches PyTorch: masked_fill -> *scaling -> softmax)
    idx = lax.broadcasted_iota(jnp.int32, (BB, T), 1)
    valid = idx < len_ref[...]
    e = jnp.where(valid, e, -jnp.inf) * scaling

    # --- softmax over T (lane axis)
    m = jnp.max(e, axis=-1, keepdims=True)
    p = jnp.exp(e - m)
    attn = p * pl.reciprocal(jnp.sum(p, axis=-1, keepdims=True), approx=False)

    # --- context = sum_t attn[b,t] * enc[b,t,:]  (VPU weighted reduce; keeps the
    #     M=1 batched matmul off the MXU, f32 accuracy for attn and enc).
    ctx = jnp.sum(attn[:, :, None] * enc.astype(jnp.float32), axis=1)   # [BB, E]

    # --- output projection
    out = jnp.dot(ctx.astype(w_out_ref.dtype), w_out_ref[...],
                  preferred_element_type=jnp.float32) + b_out_ref[...]  # [BB, O]

    ctx_ref[...] = out.astype(ctx_ref.dtype)
    attn_ref[...] = attn.astype(attn_ref.dtype)


def content_based_attention(enc_states, enc_len, dec_states, params,
                            scaling=1.0, block_b=None, use_bf16=True,
                            tanh_bf16=None):
    """Forward pass of ContentBasedAttention.  Returns (context [B,O], attn [B,T])."""
    B, T, E = enc_states.shape
    D = dec_states.shape[1]
    A = params["w_enc"].shape[1]
    O = params["w_out"].shape[1]

    if tanh_bf16 is None:
        tanh_bf16 = use_bf16          # set False explicitly on v5e (no bf16 EUP/VPU)
    md = jnp.bfloat16 if use_bf16 else jnp.float32
    ms = 2 if use_bf16 else 4

    # Lane-facing dims -> multiples of 128 (dense vregs / unmasked vst).
    # T is a sublane axis inside the enc block (and the attn-output block spans the
    # full T dim), so it only needs the dtype's sublane packing.
    E_pad = _rup(E, 128)
    A_pad = _rup(A, 128)
    O_pad = _rup(O, 128)
    T_pad = _rup(T, 16 if use_bf16 else 8)

    a_chunk = 256 if (A_pad % 256 == 0) else 128
    n_chunks = A_pad // a_chunk

    # ---- VMEM budget: count what actually lives in VMEM per grid step ----------
    per_row = T_pad * (2 * E_pad * ms        # enc input block, double-buffered
                       + E_pad * 4           # f32 enc upcast / attn*enc product
                       + 2 * a_chunk * 4     # enc_h chunk + tanh temp (f32)
                       + 8 * 4)              # e / p / attn + attn output (x2 buf)
    per_row += (E_pad + 2 * A_pad + 2 * O_pad) * 4 + 2 * D * ms
    fixed = (2 * ((E_pad * A_pad + D * A_pad + E_pad * O_pad) * ms
                  + (3 * A_pad + O_pad) * 4)
             + (1 << 20))                    # headroom for compiler scratch

    if block_b is None:
        budget = 20 << 20                    # live-buffer target, safe on all gens
        bb = max(8, ((budget - fixed) // per_row // 8) * 8)
        bb = min(bb, 256, _rup(B, 8))
        if B > 8:                            # keep grid >= 2 (v7x megacore / overlap)
            bb = min(bb, max(8, _rup(-(-B // 2), 8)))
        block_b = int(bb)
    BB = int(block_b)
    B_pad = _rup(B, BB)

    est = fixed + BB * per_row
    if est > (44 << 20):
        # TODO(synk): fall back to flash-style T-tiling with online softmax instead
        # of refusing (needed for very long sequences / very large enc_dim).
        raise ValueError(
            f"ContentBasedAttention Pallas kernel needs ~{est >> 20} MiB of VMEM per "
            f"grid step even at block_b={BB}; implement T-tiling for this shape.")
    vmem_limit = int(min(max(est * 3 // 2 + (2 << 20), 32 << 20), 56 << 20))

    # ---- one-time (XLA) padding / casting / bias folding ------------------------
    enc_p  = _pad_to(enc_states.astype(md), (B_pad, T_pad, E_pad))
    dec_p  = _pad_to(dec_states.astype(md), (B_pad, D))
    w_enc  = _pad_to(params["w_enc"].astype(md), (E_pad, A_pad))
    w_dec  = _pad_to(params["w_dec"].astype(md), (D, A_pad))
    b_fold = _pad_to((params["b_enc"] + params["b_dec"]).astype(jnp.float32), (1, A_pad))
    w_attn = _pad_to(params["w_attn"].astype(jnp.float32), (1, A_pad))
    w_out  = _pad_to(params["w_out"].astype(md), (E_pad, O_pad))
    b_out  = _pad_to(params["b_out"].astype(jnp.float32), (1, O_pad))
    # Padded batch rows get length T so they never hit the all--inf softmax path.
    lens = jnp.full((B_pad, 1), T, dtype=jnp.int32)
    lens = lens.at[:B, 0].set(enc_len.astype(jnp.int32))

    kernel = functools.partial(_content_attn_kernel, float(scaling),
                               int(a_chunk), int(n_chunks), bool(tanh_bf16))

    grid_spec = pltpu.PrefetchScalarGridSpec(
        num_scalar_prefetch=0,
        grid=(B_pad // BB,),
        in_specs=[
            pl.BlockSpec((BB, 1),            lambda b: (b, 0)),    # enc_len
            # NOTE: if the trace shows exposed enc DMA on v6e, add
            # pipeline_mode=pl.Buffered(3) here (not on v7x: VMEM-constrained).
            pl.BlockSpec((BB, T_pad, E_pad), lambda b: (b, 0, 0)),  # enc_states
            pl.BlockSpec((BB, D),            lambda b: (b, 0)),    # dec_states
            pl.BlockSpec((E_pad, A_pad),     lambda b: (0, 0)),    # W_enc^T (resident)
            pl.BlockSpec((D, A_pad),         lambda b: (0, 0)),    # W_dec^T (resident)
            pl.BlockSpec((1, A_pad),         lambda b: (0, 0)),    # b_enc + b_dec
            pl.BlockSpec((1, A_pad),         lambda b: (0, 0)),    # w_attn
            pl.BlockSpec((E_pad, O_pad),     lambda b: (0, 0)),    # W_out^T (resident)
            pl.BlockSpec((1, O_pad),         lambda b: (0, 0)),    # b_out
        ],
        out_specs=[
            pl.BlockSpec((BB, O_pad), lambda b: (b, 0)),           # context
            pl.BlockSpec((BB, T_pad), lambda b: (b, 0)),           # attention weights
        ],
    )

    ctx_p, attn_p = pl.pallas_call(
        kernel,
        grid_spec=grid_spec,
        out_shape=(jax.ShapeDtypeStruct((B_pad, O_pad), jnp.float32),
                   jax.ShapeDtypeStruct((B_pad, T_pad), jnp.float32)),
        compiler_params=pltpu.CompilerParams(
            dimension_semantics=("parallel",),     # batch blocks -> both TCs on v7x
            vmem_limit_bytes=vmem_limit,
        ),
    )(lens, enc_p, dec_p, w_enc, w_dec, b_fold, w_attn, w_out, b_out)

    return ctx_p[:B, :O], attn_p[:B, :T]


def _reference(enc_states, enc_len, dec_states, params, scaling=1.0):
    """Pure-JAX mirror of the PyTorch forward, for correctness checking."""
    B, T, E = enc_states.shape
    enc_h = enc_states @ params["w_enc"] + params["b_enc"]                    # [B,T,A]
    dec_h = dec_states @ params["w_dec"] + params["b_dec"]                    # [B,A]
    e = jnp.sum(jnp.tanh(enc_h + dec_h[:, None, :]) * params["w_attn"], -1)  # [B,T]
    mask = jnp.arange(T)[None, :] < enc_len[:, None]
    e = jnp.where(mask, e, -jnp.inf) * scaling
    attn = jax.nn.softmax(e, axis=-1)
    ctx = jnp.einsum("bt,bte->be", attn, enc_states)
    ctx = ctx @ params["w_out"] + params["b_out"]
    return ctx, attn


def _run_case(key, B, T, ENC, DEC, ATTN, OUT, scaling, enc_len, bf16_tol):
    ks = jax.random.split(key, 8)
    params = {
        "w_enc":  jax.random.normal(ks[0], (ENC, ATTN), jnp.float32) * 0.1,
        "b_enc":  jax.random.normal(ks[1], (1, ATTN),   jnp.float32) * 0.1,
        "w_dec":  jax.random.normal(ks[2], (DEC, ATTN), jnp.float32) * 0.1,
        "b_dec":  jax.random.normal(ks[3], (1, ATTN),   jnp.float32) * 0.1,
        "w_attn": jax.random.normal(ks[4], (1, ATTN),   jnp.float32) * 0.1,
        "w_out":  jax.random.normal(ks[5], (ENC, OUT),  jnp.float32) * 0.1,
        "b_out":  jax.random.normal(ks[6], (1, OUT),    jnp.float32) * 0.1,
    }
    dkeys = jax.random.split(ks[7], 2)
    enc_states = jax.random.normal(dkeys[0], (B, T, ENC), jnp.float32)
    dec_states = jax.random.normal(dkeys[1], (B, DEC), jnp.float32)

    ctx_bf, attn_bf = content_based_attention(
        enc_states, enc_len, dec_states, params, scaling, use_bf16=True)
    ctx_f32, attn_f32 = content_based_attention(
        enc_states, enc_len, dec_states, params, scaling, use_bf16=False)
    jax.block_until_ready((ctx_bf, attn_bf, ctx_f32, attn_f32))

    ctx_ref, attn_ref = _reference(enc_states, enc_len, dec_states, params, scaling)

    assert ctx_bf.shape == (B, OUT) and attn_bf.shape == (B, T)
    assert ctx_f32.shape == (B, OUT) and attn_f32.shape == (B, T)
    assert jnp.allclose(ctx_f32, ctx_ref, atol=1e-4, rtol=1e-4)
    assert jnp.allclose(attn_f32, attn_ref, atol=1e-4, rtol=1e-4)
    assert jnp.allclose(ctx_bf, ctx_ref, atol=bf16_tol, rtol=bf16_tol)
    assert jnp.allclose(attn_bf, attn_ref, atol=bf16_tol, rtol=bf16_tol)


if __name__ == "__main__":
    key = jax.random.PRNGKey(0)
    k1, k2 = jax.random.split(key)

    # Case 1: tiny shapes from the module docstring scale (grid=1, single A-chunk).
    _run_case(k1, B=4, T=8, ENC=16, DEC=24, ATTN=32, OUT=8, scaling=1.0,
              enc_len=jnp.array([8, 5, 7, 8], dtype=jnp.int32), bf16_tol=5e-2)

    # Case 2: exercises multiple batch-blocks (grid=2) and multiple A-chunks
    # (ATTN=300 -> A_pad=384 -> 3 chunks of 128), non-multiple-of-8 T.
    enc_len2 = ((jnp.arange(16, dtype=jnp.int32) * 7) % 40) + 1
    _run_case(k2, B=16, T=40, ENC=72, DEC=48, ATTN=300, OUT=24, scaling=1.0,
              enc_len=enc_len2, bf16_tol=1e-1)

    print("KERNEL_OK")
</pallas_src>

<mosaic_0001>
module attributes {stable_mosaic.version = 11 : i64} {
  func.func @_content_attn_kernel(%arg0: i32, %arg1: memref<8x1xi32, #tpu.memory_space<vmem>>, %arg2: memref<8x16x128xbf16, #tpu.memory_space<vmem>>, %arg3: memref<8x24xbf16, #tpu.memory_space<vmem>>, %arg4: memref<128x128xbf16, #tpu.memory_space<vmem>>, %arg5: memref<24x128xbf16, #tpu.memory_space<vmem>>, %arg6: memref<1x128xf32, #tpu.memory_space<vmem>>, %arg7: memref<1x128xf32, #tpu.memory_space<vmem>>, %arg8: memref<128x128xbf16, #tpu.memory_space<vmem>>, %arg9: memref<1x128xf32, #tpu.memory_space<vmem>>, %arg10: memref<8x128xf32, #tpu.memory_space<vmem>>, %arg11: memref<8x16xf32, #tpu.memory_space<vmem>>) attributes {dimension_semantics = [#tpu.dimension_semantics<parallel>], iteration_bounds = array<i64: 1>, scalar_prefetch = 0 : i64, scratch_operands = 0 : i64, tpu.core_type = #tpu.core_type<tc>, window_params = [{transform_indices = @transform_0, window_bounds = array<i64: 8, 1>}, {transform_indices = @transform_1, window_bounds = array<i64: 8, 16, 128>}, {transform_indices = @transform_2, window_bounds = array<i64: 8, 24>}, {pipeline_mode = #tpu.pipeline_mode<synchronous>, transform_indices = @transform_3, window_bounds = array<i64: 128, 128>}, {pipeline_mode = #tpu.pipeline_mode<synchronous>, transform_indices = @transform_4, window_bounds = array<i64: 24, 128>}, {pipeline_mode = #tpu.pipeline_mode<synchronous>, transform_indices = @transform_5, window_bounds = array<i64: 1, 128>}, {pipeline_mode = #tpu.pipeline_mode<synchronous>, transform_indices = @transform_6, window_bounds = array<i64: 1, 128>}, {pipeline_mode = #tpu.pipeline_mode<synchronous>, transform_indices = @transform_7, window_bounds = array<i64: 128, 128>}, {pipeline_mode = #tpu.pipeline_mode<synchronous>, transform_indices = @transform_8, window_bounds = array<i64: 1, 128>}, {transform_indices = @transform_9, window_bounds = array<i64: 8, 128>}, {transform_indices = @transform_10, window_bounds = array<i64: 8, 16>}]} {
    %c0 = arith.constant 0 : index
    %c0_0 = arith.constant 0 : index
    %c0_1 = arith.constant 0 : index
    %0 = vector.load %arg2[%c0, %c0_0, %c0_1] : memref<8x16x128xbf16, #tpu.memory_space<vmem>>, vector<8x16x128xbf16>
    %c0_2 = arith.constant 0 : index
    %c0_3 = arith.constant 0 : index
    %1 = vector.load %arg3[%c0_2, %c0_3] : memref<8x24xbf16, #tpu.memory_space<vmem>>, vector<8x24xbf16>
    %2 = vector.shape_cast %0 : vector<8x16x128xbf16> to vector<128x128xbf16>
    %cst = arith.constant 0.000000e+00 : f32
    %3 = vector.broadcast %cst : f32 to vector<8x16xf32>
    %c0_4 = arith.constant 0 : index
    %c0_5 = arith.constant 0 : index
    %4 = vector.load %arg4[%c0_4, %c0_5] : memref<128x128xbf16, #tpu.memory_space<vmem>>, vector<128x128xbf16>
    %c0_6 = arith.constant 0 : index
    %c0_7 = arith.constant 0 : index
    %5 = vector.load %arg5[%c0_6, %c0_7] : memref<24x128xbf16, #tpu.memory_space<vmem>>, vector<24x128xbf16>
    %c0_8 = arith.constant 0 : index
    %c0_9 = arith.constant 0 : index
    %6 = vector.load %arg6[%c0_8, %c0_9] : memref<1x128xf32, #tpu.memory_space<vmem>>, vector<1x128xf32>
    %c0_10 = arith.constant 0 : index
    %c0_11 = arith.constant 0 : index
    %7 = vector.load %arg7[%c0_10, %c0_11] : memref<1x128xf32, #tpu.memory_space<vmem>>, vector<1x128xf32>
    %cst_12 = arith.constant dense<0.000000e+00> : vector<128x128xf32>
    %8 = tpu.matmul %2, %4, %cst_12 {dimension_numbers = #tpu.dot_dimension_numbers<[1], [0], [0], [1], [0, 0, 1, 1], [], []>} : vector<128x128xbf16>, vector<128x128xbf16>, vector<128x128xf32> -> vector<128x128xf32>
    %9 = vector.shape_cast %8 : vector<128x128xf32> to vector<8x16x128xf32>
    %cst_13 = arith.constant dense<0.000000e+00> : vector<8x128xf32>
    %10 = tpu.matmul %1, %5, %cst_13 {dimension_numbers = #tpu.dot_dimension_numbers<[1], [0], [0], [1], [0, 0, 1, 1], [], []>} : vector<8x24xbf16>, vector<24x128xbf16>, vector<8x128xf32> -> vector<8x128xf32>
    %11 = vector.broadcast %6 : vector<1x128xf32> to vector<8x128xf32>
    %12 = arith.addf %10, %11 : vector<8x128xf32>
    %13 = vector.shape_cast %12 : vector<8x128xf32> to vector<8x1x128xf32>
    %14 = vector.broadcast %13 : vector<8x1x128xf32> to vector<8x16x128xf32>
    %15 = arith.addf %9, %14 : vector<8x16x128xf32>
    %16 = arith.truncf %15 : vector<8x16x128xf32> to vector<8x16x128xbf16>
    %17 = math.tanh %16 : vector<8x16x128xbf16>
    %18 = arith.extf %17 : vector<8x16x128xbf16> to vector<8x16x128xf32>
    %19 = vector.shape_cast %7 : vector<1x128xf32> to vector<1x1x128xf32>
    %20 = vector.broadcast %19 : vector<1x1x128xf32> to vector<8x16x128xf32>
    %21 = arith.mulf %18, %20 : vector<8x16x128xf32>
    %cst_14 = arith.constant dense<0.000000e+00> : vector<8x16xf32>
    %22 = vector.multi_reduction <add>, %21, %cst_14 [2] : vector<8x16x128xf32> to vector<8x16xf32>
    %23 = arith.addf %3, %22 : vector<8x16xf32>
    %24 = tpu.iota {dimensions = array<i32: 1>} : vector<8x16xi32>
    %c0_15 = arith.constant 0 : index
    %c0_16 = arith.constant 0 : index
    %25 = vector.load %arg1[%c0_15, %c0_16] : memref<8x1xi32, #tpu.memory_space<vmem>>, vector<8x1xi32>
    %26 = vector.broadcast %25 : vector<8x1xi32> to vector<8x16xi32>
    %27 = arith.cmpi slt, %24, %26 : vector<8x16xi32>
    %cst_17 = arith.constant 0xFF800000 : f32
    %28 = vector.broadcast %cst_17 : f32 to vector<8x16xf32>
    %29 = arith.select %27, %23, %28 : vector<8x16xi1>, vector<8x16xf32>
    %cst_18 = arith.constant 1.000000e+00 : f32
    %30 = vector.broadcast %cst_18 : f32 to vector<8x16xf32>
    %31 = arith.mulf %29, %30 : vector<8x16xf32>
    %cst_19 = arith.constant dense<0xFF800000> : vector<8xf32>
    %32 = vector.multi_reduction <maximumf>, %31, %cst_19 [1] : vector<8x16xf32> to vector<8xf32>
    %33 = vector.shape_cast %32 : vector<8xf32> to vector<8x1xf32>
    %34 = vector.broadcast %33 : vector<8x1xf32> to vector<8x16xf32>
    %35 = arith.subf %31, %34 : vector<8x16xf32>
    %36 = math.exp %35 : vector<8x16xf32>
    %cst_20 = arith.constant dense<0.000000e+00> : vector<8xf32>
    %37 = vector.multi_reduction <add>, %36, %cst_20 [1] : vector<8x16xf32> to vector<8xf32>
    %38 = vector.shape_cast %37 : vector<8xf32> to vector<8x1xf32>
    %39 = tpu.reciprocal %38 : vector<8x1xf32> -> vector<8x1xf32>
    %40 = vector.broadcast %39 : vector<8x1xf32> to vector<8x16xf32>
    %41 = arith.mulf %36, %40 : vector<8x16xf32>
    %42 = vector.shape_cast %41 : vector<8x16xf32> to vector<8x16x1xf32>
    %43 = arith.extf %0 : vector<8x16x128xbf16> to vector<8x16x128xf32>
    %44 = vector.broadcast %42 : vector<8x16x1xf32> to vector<8x16x128xf32>
    %45 = arith.mulf %44, %43 : vector<8x16x128xf32>
    %cst_21 = arith.constant dense<0.000000e+00> : vector<8x128xf32>
    %46 = vector.multi_reduction <add>, %45, %cst_21 [1] : vector<8x16x128xf32> to vector<8x128xf32>
    %47 = arith.truncf %46 : vector<8x128xf32> to vector<8x128xbf16>
    %c0_22 = arith.constant 0 : index
    %c0_23 = arith.constant 0 : index
    %48 = vector.load %arg8[%c0_22, %c0_23] : memref<128x128xbf16, #tpu.memory_space<vmem>>, vector<128x128xbf16>
    %cst_24 = arith.constant dense<0.000000e+00> : vector<8x128xf32>
    %49 = tpu.matmul %47, %48, %cst_24 {dimension_numbers = #tpu.dot_dimension_numbers<[1], [0], [0], [1], [0, 0, 1, 1], [], []>} : vector<8x128xbf16>, vector<128x128xbf16>, vector<8x128xf32> -> vector<8x128xf32>
    %c0_25 = arith.constant 0 : index
    %c0_26 = arith.constant 0 : index
    %50 = vector.load %arg9[%c0_25, %c0_26] : memref<1x128xf32, #tpu.memory_space<vmem>>, vector<1x128xf32>
    %51 = vector.broadcast %50 : vector<1x128xf32> to vector<8x128xf32>
    %52 = arith.addf %49, %51 : vector<8x128xf32>
    %c0_27 = arith.constant 0 : index
    %c0_28 = arith.constant 0 : index
    %53 = vector.load %arg10[%c0_27, %c0_28] : memref<8x128xf32, #tpu.memory_space<vmem>>, vector<8x128xf32>
    tpu.vector_store %arg10[%c0_27, %c0_28], %52 {strides = array<i32>} : memref<8x128xf32, #tpu.memory_space<vmem>>, vector<8x128xf32>,
    %c0_29 = arith.constant 0 : index
    %c0_30 = arith.constant 0 : index
    %54 = vector.load %arg11[%c0_29, %c0_30] : memref<8x16xf32, #tpu.memory_space<vmem>>, vector<8x16xf32>
    tpu.vector_store %arg11[%c0_29, %c0_30], %41 {strides = array<i32>} : memref<8x16xf32, #tpu.memory_space<vmem>>, vector<8x16xf32>,
    return
  }
  func.func @transform_0(%arg0: i32) -> (i32, i32) {
    %c0_i32 = arith.constant 0 : i32
    %c0_i32_0 = arith.constant 0 : i32
    return %arg0, %c0_i32 : i32, i32
  }
  func.func @transform_1(%arg0: i32) -> (i32, i32, i32) {
    %c0_i32 = arith.constant 0 : i32
    %c0_i32_0 = arith.constant 0 : i32
    %c0_i32_1 = arith.constant 0 : i32
    return %arg0, %c0_i32, %c0_i32_0 : i32, i32, i32
  }
  func.func @transform_2(%arg0: i32) -> (i32, i32) {
    %c0_i32 = arith.constant 0 : i32
    %c0_i32_0 = arith.constant 0 : i32
    return %arg0, %c0_i32 : i32, i32
  }
  func.func @transform_3(%arg0: i32) -> (i32, i32) {
    %c0_i32 = arith.constant 0 : i32
    %c0_i32_0 = arith.constant 0 : i32
    %c0_i32_1 = arith.constant 0 : i32
    return %c0_i32, %c0_i32_0 : i32, i32
  }
  func.func @transform_4(%arg0: i32) -> (i32, i32) {
    %c0_i32 = arith.constant 0 : i32
    %c0_i32_0 = arith.constant 0 : i32
    %c0_i32_1 = arith.constant 0 : i32
    return %c0_i32, %c0_i32_0 : i32, i32
  }
  func.func @transform_5(%arg0: i32) -> (i32, i32) {
    %c0_i32 = arith.constant 0 : i32
    %c0_i32_0 = arith.constant 0 : i32
    %c0_i32_1 = arith.constant 0 : i32
    return %c0_i32, %c0_i32_0 : i32, i32
  }
  func.func @transform_6(%arg0: i32) -> (i32, i32) {
    %c0_i32 = arith.constant 0 : i32
    %c0_i32_0 = arith.constant 0 : i32
    %c0_i32_1 = arith.constant 0 : i32
    return %c0_i32, %c0_i32_0 : i32, i32
  }
  func.func @transform_7(%arg0: i32) -> (i32, i32) {
    %c0_i32 = arith.constant 0 : i32
    %c0_i32_0 = arith.constant 0 : i32
    %c0_i32_1 = arith.constant 0 : i32
    return %c0_i32, %c0_i32_0 : i32, i32
  }
  func.func @transform_8(%arg0: i32) -> (i32, i32) {
    %c0_i32 = arith.constant 0 : i32
    %c0_i32_0 = arith.constant 0 : i32
    %c0_i32_1 = arith.constant 0 : i32
    return %c0_i32, %c0_i32_0 : i32, i32
  }
  func.func @transform_9(%arg0: i32) -> (i32, i32) {
    %c0_i32 = arith.constant 0 : i32
    %c0_i32_0 = arith.constant 0 : i32
    return %arg0, %c0_i32 : i32, i32
  }
  func.func @transform_10(%arg0: i32) -> (i32, i32) {
    %c0_i32 = arith.constant 0 : i32
    %c0_i32_0 = arith.constant 0 : i32
    return %arg0, %c0_i32 : i32, i32
  }
}

</mosaic_0001>

<bundles_post_ra>
// kernel: tpu_custom_call.1
= control target key start
LH: loop header
LB: loop body
LE: loop exit
PB: predicated region body
PF: predicated region fallthrough
CT: control target
= control target key end

     0   :  { %16 = vsyncpa [#allocation3], 0  ;;  %s1451_s0 = inlined_call_operand.vmem [shape: s32[8,1], index: 0, kind: input, shape index: {}]   ;;  %s1452_s1 = inlined_call_operand.hbm [shape: bf16[8,16,128], index: 1, kind: input, shape index: {}]   ;;  %s1453_s2 = inlined_call_operand.hbm [shape: bf16[8,24], index: 2, kind: input, shape index: {}]   ;;  %s1454_s3 = inlined_call_operand.hbm [shape: bf16[128,128], index: 3, kind: input, shape index: {}]   ;;  %s1455_s4 = inlined_call_operand.vmem [shape: bf16[24,128], index: 4, kind: input, shape index: {}]   ;;  %s1456_s5 = inlined_call_operand.vmem [shape: f32[1,128], index: 5, kind: input, shape index: {}]   ;;  %s1457_s6 = inlined_call_operand.vmem [shape: f32[1,128], index: 6, kind: input, shape index: {}]   ;;  %s1458_s7 = inlined_call_operand.hbm [shape: bf16[128,128], index: 7, kind: input, shape index: {}]   ;;  %s1459_s8 = inlined_call_operand.vmem [shape: f32[1,128], index: 8, kind: input, shape index: {}]   ;;  %s1460_s9 = inlined_call_operand.hbm [shape: f32[8,128], index: 9, kind: output, shape index: {0}]   ;;  %s1461_s10 = inlined_call_operand.hbm [shape: f32[8,16], index: 10, kind: output, shape index: {1}]  }
   0x1   :  { %17 = vsyncpa [#allocation6], 0 }
   0x2   :  { %18 = vsyncpa [#allocation9], 0 }
   0x3   :  { %19 = vsyncpa [#allocation4], 0  ;;  %s41_s15 = sshll.u32 %s1453_s2, 4  ;;  %s42_s15 = int_to_ptr.hbm [resolvable:$true] %s41_s15 }
   0x4   :  { %20 = vsyncpa [#allocation12], 0  ;;  %s1289_s16 = smov [#allocation5]   ;;  %s27_s20 = sshll.u32 %s1452_s1, 4  ;;  %s28_s20 = int_to_ptr.hbm [resolvable:$true] %s27_s20 }
   0x5   :  { %s43_s17 = sshll.u32 %s1289_s16, 4  ;;  %s1290_s21 = smov [#allocation2]   ;;  %s44_s17 = int_to_ptr.vmem [resolvable:$true] %s43_s17 }
   0x6   :  { %46 = dma.hbm_to_vmem [thread:$0]  %s42_s15, 64, %s44_s17, [#allocation6]  }
   0x7   :  { %s29_s22 = sshll.u32 %s1290_s21, 4  ;;  %s1291_s23 = smov 64   ;;  %s30_s22 = int_to_ptr.vmem [resolvable:$true] %s29_s22 }
   0x8   :  { %s1292_s24 = smov 4   ;;  %s51_s2 = sshll.u32 %s1454_s3, 4  ;;  %s52_s2 = int_to_ptr.hbm [resolvable:$true] %s51_s2 }
   0x9   :  { %35 = dma.hbm_to_vmem [thread:$0]  %s28_s20, 1024, %s30_s22, [#allocation3], %s1291_s23, %s1291_s23, %s1292_s24  }
   0xa   :  { %s1293_s27 = smov [#allocation7]   ;;  %s70_s1 = sshll.u32 %s1458_s7, 4  ;;  %s71_s1 = int_to_ptr.hbm [resolvable:$true] %s70_s1 }
   0xb   :  { %s53_s28 = sshll.u32 %s1293_s27, 4  ;;  %s1294_s11 = smov [#allocation8]   ;;  %s54_s28 = int_to_ptr.vmem [resolvable:$true] %s53_s28 }
   0xc   :  { %59 = dma.hbm_to_vmem [thread:$0]  %s52_s2, 1024, %s54_s28, [#allocation6], %s1291_s23, %s1291_s23, %s1292_s24  }
   0xd   :  { %s72_s12 = sshll.u32 %s1294_s11, 4  ;;  %s73_s12 = int_to_ptr.vmem [resolvable:$true] %s72_s12 }
   0xe   :  { %78 = dma.hbm_to_vmem [thread:$0]  %s71_s1, 1024, %s73_s12, [#allocation9], %s1291_s23, %s1291_s23, %s1292_s24  }
   0xf   :  { %1279 = dma.done.wait [#allocation3], 1024  }
  0x10   :  { %1280 = vsyncadd [#allocation3], 4294966272 }
  0x11   :  { %1281 = dma.done.wait [#allocation6], 1088  }
  0x12   :  { %1282 = vsyncadd [#allocation6], 4294966208 }
  0x13   :  { %1283 = dma.done.wait [#allocation9], 1024  }
  0x14   :  { %1284 = vsyncadd [#allocation9], 4294966272  ;;  %v1050_v0 = vld [vmem:[#allocation7 + $0x38] sm:$0xff]  ;;  %v1049_v1 = vld [vmem:[#allocation7 + $0x30] sm:$0xff]  ;;  %vm297_vm0 = vcmask 1043456   ;;  %vm293_vm1 = vcmask 195584  }
  0x15   :  { %232 = vmatpush.bf16.msra.mxu0 %v1050_v0  ;;  %1060 = vmatpush.bf16.msra.mxu1 %v1050_v0  ;;  %v1048_v2 = vld [vmem:[#allocation7 + $0x28] sm:$0xff]  ;;  %v1047_v3 = vld [vmem:[#allocation7 + $0x20] sm:$0xff]  ;;  %v1046_v4 = vld [vmem:[#allocation7 + $0x18] sm:$0xff]  ;;  %vm527_vm2 = vcmask 130112   ;;  %vm550_vm3 = vcmask 1041409   ;;  %vm552_vm4 = vcmask 1042434  }
  0x16   :  { %1061 = vmatpush.bf16.msra.mxu3 %v1050_v0  ;;  %v133_v5 = vld [vmem:[%s1455_s4 + $0x8] sm:$0xf]  ;;  %v1045_v6 = vld [vmem:[#allocation7 + $0x10] sm:$0xff]  ;;  %v1044_v8 = vld [vmem:[#allocation7 + $0x8] sm:$0xff]  ;;  %vm554_vm5 = vcmask 1043459   ;;  %vm556_vm6 = vcmask 1044484  }
  0x17   :  { %v289_v7 = vunpack.c.l.b16 %v133_v5  ;;  %v1043_v10 = vld [vmem:[#allocation7] sm:$0xff]  ;;  %v1038_v13 = vld [vmem:[#allocation2 + $0x18] sm:$0xff]  ;;  %v1041_v18 = vld [vmem:[#allocation2 + $0x30] sm:$0xff]  ;;  %vm558_vm7 = vcmask 1045509   ;;  %vm560_vm8 = vcmask 1046534   ;;  %vm562_vm9 = vcmask 1047559  }
  0x18   :  { %v1035_v12 = vld [vmem:[#allocation2] sm:$0xff]  ;;  %v1040_v14 = vld [vmem:[#allocation2 + $0x28] sm:$0xff]  ;;  %v1037_v19 = vld [vmem:[#allocation2 + $0x10] sm:$0xff]  ;;  %vm566_vm10 = vcmask 130048   ;;  %s917_s19 = sshll.u32 %s1461_s10, 4  ;;  %s1296_s20 = smov [#allocation11]   ;;  %s918_s19 = int_to_ptr.hbm [resolvable:$true] %s917_s19 }
  0x19   :  { %233 = vmatpush.bf16.msra.mxu0 %v1049_v1  ;;  %1062 = vmatpush.bf16.msra.mxu1 %v1049_v1  ;;  %v291_v9 = vpack.c.b16 %v289_v7, %v289_v7  ;;  %v1051_v15 = vld [vmem:[%s1455_s4] sm:$0xff]  ;;  %v1036_v16 = vld [vmem:[#allocation2 + $0x8] sm:$0xff]  ;;  %v1042_v20 = vld [vmem:[#allocation2 + $0x38] sm:$0xff]  ;;  %s915_s21 = sshll.u32 %s1296_s20, 4  ;;  %s1297_s24 = smov [#allocation10]   ;;  %s916_s21 = int_to_ptr.vmem [resolvable:$true] %s915_s21 }
  0x1a   :  { %1063 = vmatpush.bf16.msra.mxu3 %v1049_v1  ;;  %v1039_v17 = vld [vmem:[#allocation2 + $0x20] sm:$0xff]  ;;  %s904_s25 = sshll.u32 %s1297_s24, 4  ;;  %s906_s27 = sshll.u32 %s1460_s9, 4  ;;  %s905_s25 = int_to_ptr.vmem [resolvable:$true] %s904_s25  ;;  %s907_s27 = int_to_ptr.hbm [resolvable:$true] %s906_s27 }
  0x1b   :  { %v299_v11 = vsel %vm297_vm0, %v291_v9, 0  ;;  %v114_v21 = vld [vmem:[#allocation5] sm:$0xf] }
  0x1c   :  { %v1096_v32 = vld [vmem:[%s1456_s5] ss:$0 sm:$0xff] }
  0x1d   :  { %234 = vmatpush.bf16.msra.mxu0 %v1048_v2  ;;  %1064 = vmatpush.bf16.msra.mxu1 %v1048_v2 }
  0x1e   :  { %1065 = vmatpush.bf16.msra.mxu3 %v1048_v2 }
  0x21   :  { %235 = vmatpush.bf16.msra.mxu0 %v1047_v3  ;;  %1066 = vmatpush.bf16.msra.mxu1 %v1047_v3 }
  0x22   :  { %1067 = vmatpush.bf16.msra.mxu3 %v1047_v3 }
  0x25   :  { %236 = vmatpush.bf16.msra.mxu0 %v1046_v4  ;;  %1068 = vmatpush.bf16.msra.mxu1 %v1046_v4 }
  0x26   :  { %1069 = vmatpush.bf16.msra.mxu3 %v1046_v4 }
  0x29   :  { %237 = vmatpush.bf16.msra.mxu0 %v1045_v6  ;;  %1070 = vmatpush.bf16.msra.mxu1 %v1045_v6 }
  0x2a   :  { %1071 = vmatpush.bf16.msra.mxu3 %v1045_v6 }
  0x2d   :  { %238 = vmatpush.bf16.msra.mxu0 %v1044_v8  ;;  %1072 = vmatpush.bf16.msra.mxu1 %v1044_v8 }
  0x2e   :  { %1073 = vmatpush.bf16.msra.mxu3 %v1044_v8 }
  0x31   :  { %239 = vmatpush.bf16.msra.mxu0 %v1043_v10  ;;  %1074 = vmatpush.bf16.msra.mxu1 %v1043_v10 }
  0x32   :  { %1075 = vmatpush.bf16.msra.mxu3 %v1043_v10 }
  0x34   :  { %240 = vmatmul.bf16.vlgmr.msra.gmra.mxu0 %v1035_v12  ;;  %255 = vmatmul.bf16.vlgmr.msra.gmra.mxu1 %v1038_v13 }
  0x35   :  { %307 = vmatpush.bf16.msrb.mxu1 %v299_v11  ;;  %265 = vmatmul.bf16.vlgmr.msra.gmra.mxu3 %v1040_v14 }
  0x39   :  { %308 = vmatpush.bf16.msrb.mxu1 %v1051_v15 }
  0x44   :  { %245 = vmatmul.bf16.gmra.mxu0 %v1036_v16  ;;  %260 = vmatmul.bf16.gmra.mxu1 %v1039_v17  ;;  %v1392_v16 = vld [vmem:[%s1457_s6] ss:$0 sm:$0xff] }
  0x45   :  { %270 = vmatmul.bf16.gmra.mxu3 %v1041_v18 }
  0x54   :  { %250 = vmatmul.bf16.gmra.mxu0 %v1037_v19  ;;  %1002 = vmatmul.msk.bf16.vlgmr.msrb.gmra.mxu1 %vm293_vm1, %v114_v21 }
  0x55   :  { %275 = vmatmul.bf16.gmra.mxu3 %v1042_v20 }
  0xb1   :  { %v241_v22 = vpop.f32.mrf.mxu0  ;;  %v256_v23 = vpop.f32.mrf.mxu1 }
  0xb8   :  { %v1371_v26 = vpop.f32.mrf.mxu3 }
  0xb9   :  { %v243_v24 = vpop.f32.mrf.mxu0  ;;  %v258_v25 = vpop.f32.mrf.mxu1 }
  0xc0   :  { %v268_v29 = vpop.f32.mrf.mxu3 }
  0xc1   :  { %v261_v27 = vpop.f32.mrf.mxu1  ;;  %v246_v28 = vpop.f32.mrf.mxu0 }
  0xc8   :  { %v1376_v33 = vpop.f32.mrf.mxu3 }
  0xc9   :  { %v263_v30 = vpop.f32.mrf.mxu1  ;;  %v248_v31 = vpop.f32.mrf.mxu0 }
  0xd0   :  { %v1386_v60 = vpop.f32.mrf.mxu3 }
  0xd1   :  { %v310_v34 = vpop.f32.mrf.mxu1  ;;  %v251_v44 = vpop.f32.mrf.mxu0 }
  0xd2   :  { %v1378_v35 = vadd.f32 %v1096_v32, %v310_v34 }
  0xd4   :  { %v316_v36 = vrot.slane %v1378_v35, 2  ;;  %v322_v37 = vperm.slane %v1378_v35, 0  ;;  %v315_v38 = vrot.slane %v1378_v35, 1  ;;  %v318_v39 = vrot.slane %v1378_v35, 4 }
  0xd5   :  { %v317_v40 = vrot.slane %v1378_v35, 3  ;;  %v319_v48 = vrot.slane %v1378_v35, 5  ;;  %v320_v12 = vrot.slane %v1378_v35, 6 }
  0xd6   :  { %v324_v41 = vperm.slane %v316_v36, 0  ;;  %v338_v42 = vadd.f32 %v322_v37, %v241_v22  ;;  %v323_v43 = vperm.slane %v315_v38, 0  ;;  %v339_v45 = vadd.f32 %v322_v37, %v243_v24 }
  0xd7   :  { %v326_v46 = vperm.slane %v318_v39, 0  ;;  %v325_v47 = vperm.slane %v317_v40, 0  ;;  %v327_v0 = vperm.slane %v319_v48, 0  ;;  %v321_v22 = vrot.slane %v1378_v35, 7 }
  0xd8   :  { %v342_v49 = vadd.f32 %v324_v41, %v251_v44  ;;  %v354_v50 = vpack.c.bf16 %v338_v42, %v338_v42  ;;  %v340_v51 = vadd.f32 %v323_v43, %v246_v28  ;;  %v341_v52 = vadd.f32 %v323_v43, %v248_v31  ;;  %v276_v21 = vpop.f32.mrf.mxu3 }
  0xd9   :  { %v312_v53 = vpop.f32.mrf.mxu1  ;;  %v355_v54 = vpack.c.bf16 %v339_v45, %v339_v45  ;;  %v346_v55 = vadd.f32 %v326_v46, %v261_v27  ;;  %v344_v59 = vadd.f32 %v325_v47, %v256_v23  ;;  %v345_v5 = vadd.f32 %v325_v47, %v258_v25  ;;  %v253_v14 = vpop.f32.mrf.mxu0 }
  0xda   :  { %v358_v56 = vpack.c.bf16 %v342_v49, %v342_v49  ;;  %v370_v57 = vunpack.c.l.bf16 %v354_v50  ;;  %v356_v58 = vpack.c.bf16 %v340_v51, %v340_v51  ;;  %v357_v62 = vpack.c.bf16 %v341_v52, %v341_v52 }
  0xdb   :  { %v371_v61 = vunpack.c.l.bf16 %v355_v54  ;;  %v362_v63 = vpack.c.bf16 %v346_v55, %v346_v55  ;;  %v360_v4 = vpack.c.bf16 %v344_v59, %v344_v59  ;;  %v349_v7 = vadd.f32 %v327_v0, %v268_v29 }
  0xdc   :  { %1099 = vtanh.f32 %v370_v57  ;;  %v372_v1 = vunpack.c.l.bf16 %v356_v58  ;;  %v374_v2 = vunpack.c.l.bf16 %v358_v56  ;;  %v373_v3 = vunpack.c.l.bf16 %v357_v62 }
  0xdd   :  { %1101 = vtanh.f32 %v371_v61  ;;  %v378_v6 = vunpack.c.l.bf16 %v362_v63  ;;  %v361_v8 = vpack.c.bf16 %v345_v5, %v345_v5  ;;  %v376_v10 = vunpack.c.l.bf16 %v360_v4 }
  0xde   :  { %1103 = vtanh.f32 %v372_v1  ;;  %v347_v11 = vadd.f32 %v326_v46, %v263_v30  ;;  %v365_v17 = vpack.c.bf16 %v349_v7, %v349_v7  ;;  %v348_v20 = vadd.f32 %v327_v0, %v1371_v26 }
  0xdf   :  { %1105 = vtanh.f32 %v374_v2  ;;  %v377_v19 = vunpack.c.l.bf16 %v361_v8  ;;  %v343_v25 = vadd.f32 %v324_v41, %v253_v14  ;;  %v328_v28 = vperm.slane %v320_v12, 0 }
  0xe0   :  { %1107 = vtanh.f32 %v373_v3  ;;  %v363_v27 = vpack.c.bf16 %v347_v11, %v347_v11  ;;  %v381_v34 = vunpack.c.l.bf16 %v365_v17  ;;  %v364_v38 = vpack.c.bf16 %v348_v20, %v348_v20 }
  0xe1   :  { %1109 = vtanh.f32 %v378_v6  ;;  %v350_v42 = vadd.f32 %v328_v28, %v1376_v33  ;;  %v329_v43 = vperm.slane %v321_v22, 0  ;;  %v359_v44 = vpack.c.bf16 %v343_v25, %v343_v25  ;;  %v278_v33 = vpop.f32.mrf.mxu3 }
  0xe2   :  { %v1100_v9 = vpop.eup %1099  ;;  %1111 = vtanh.f32 %v376_v10  ;;  %v379_v41 = vunpack.c.l.bf16 %v363_v27  ;;  %v380_v49 = vunpack.c.l.bf16 %v364_v38  ;;  %v351_v50 = vadd.f32 %v328_v28, %v1386_v60 }
  0xe3   :  { %v1102_v13 = vpop.eup %1101  ;;  %v402_v15 = vpack.c.bf16 %v1100_v9, %v1100_v9  ;;  %1113 = vtanh.f32 %v377_v19  ;;  %v366_v53 = vpack.c.bf16 %v350_v42, %v350_v42  ;;  %v352_v54 = vadd.f32 %v329_v43, %v276_v21 }
  0xe4   :  { %v1104_v18 = vpop.eup %1103  ;;  %v403_v32 = vpack.c.bf16 %v1102_v13, %v1102_v13  ;;  %1115 = vtanh.f32 %v381_v34  ;;  %v375_v55 = vunpack.c.l.bf16 %v359_v44  ;;  %v367_v59 = vpack.c.bf16 %v351_v50, %v351_v50 }
  0xe5   :  { %v418_v23 = vunpack.c.l.bf16 %v402_v15  ;;  %v404_v24 = vpack.c.bf16 %v1104_v18, %v1104_v18  ;;  %v1106_v29 = vpop.eup %1105  ;;  %1117 = vtanh.f32 %v379_v41  ;;  %v353_v60 = vadd.f32 %v329_v43, %v278_v33 }
  0xe6   :  { %v1108_v36 = vpop.eup %1107  ;;  %v406_v37 = vpack.c.bf16 %v1106_v29, %v1106_v29  ;;  %v419_v45 = vunpack.c.l.bf16 %v403_v32  ;;  %1119 = vtanh.f32 %v380_v49  ;;  %v382_v0 = vunpack.c.l.bf16 %v366_v53 }
  0xe7   :  { %v437_v30 = vmul.f32 %v1392_v16, %v418_v23  ;;  %v420_v31 = vunpack.c.l.bf16 %v404_v24  ;;  %v1110_v26 = vpop.eup %1109  ;;  %v405_v39 = vpack.c.bf16 %v1108_v36, %v1108_v36  ;;  %v1295_v1 = vmov 0  }
  0xe8   :  { %v422_v40 = vunpack.c.l.bf16 %v406_v37  ;;  %v1112_v46 = vpop.eup %1111  ;;  %v410_v48 = vpack.c.bf16 %v1110_v26, %v1110_v26  ;;  %v438_v56 = vmul.f32 %v1392_v16, %v419_v45  ;;  %1085 = vset.pattern.permute.xlu1 %v1295_v1  ;;  %v368_v2 = vpack.c.bf16 %v352_v54, %v352_v54  ;;  %v503_v45 = vld [vmem:[%s1451_s0] sm:$0xff] }
  0xe9   :  { %453 = vadd.xlane.f32.xlu0 %v437_v30  ;;  %v439_v35 = vmul.f32 %v1392_v16, %v420_v31  ;;  %v421_v51 = vunpack.c.l.bf16 %v405_v39  ;;  %v1114_v52 = vpop.eup %1113  ;;  %v408_v57 = vpack.c.bf16 %v1112_v46, %v1112_v46  ;;  %1121 = vtanh.f32 %v375_v55 }
  0xea   :  { %v441_v47 = vmul.f32 %v1392_v16, %v422_v40  ;;  %v426_v58 = vunpack.c.l.bf16 %v410_v48  ;;  %v1116_v61 = vpop.eup %1115  ;;  %v409_v63 = vpack.c.bf16 %v1114_v52, %v1114_v52  ;;  %v383_v7 = vunpack.c.l.bf16 %v367_v59 }
  0xeb   :  { %457 = vadd.xlane.f32.xlu1 %v439_v35  ;;  %v440_v62 = vmul.f32 %v1392_v16, %v421_v51  ;;  %v424_v3 = vunpack.c.l.bf16 %v408_v57  ;;  %v1118_v4 = vpop.eup %1117  ;;  %v413_v6 = vpack.c.bf16 %v1116_v61, %v1116_v61  ;;  %v369_v10 = vpack.c.bf16 %v353_v60, %v353_v60 }
  0xec   :  { %461 = vadd.xlane.f32.xlu2 %v441_v47  ;;  %v445_v5 = vmul.f32 %v1392_v16, %v426_v58  ;;  %v425_v8 = vunpack.c.l.bf16 %v409_v63  ;;  %v1120_v9 = vpop.eup %1119  ;;  %1123 = vtanh.f32 %v382_v0  ;;  %v384_v11 = vunpack.c.l.bf16 %v368_v2 }
  0xed   :  { %v443_v12 = vmul.f32 %v1392_v16, %v424_v3  ;;  %v411_v13 = vpack.c.bf16 %v1118_v4, %v1118_v4  ;;  %v429_v14 = vunpack.c.l.bf16 %v413_v6  ;;  %1125 = vtanh.f32 %v383_v7 }
  0xee   :  { %v444_v17 = vmul.f32 %v1392_v16, %v425_v8  ;;  %v412_v18 = vpack.c.bf16 %v1120_v9, %v1120_v9  ;;  %v385_v19 = vunpack.c.l.bf16 %v369_v10  ;;  %1127 = vtanh.f32 %v384_v11 }
  0xef   :  { %v1122_v15 = vpop.eup %1121  ;;  %v427_v20 = vunpack.c.l.bf16 %v411_v13  ;;  %v448_v23 = vmul.f32 %v1392_v16, %v429_v14  ;;  %v501_v33 = vlaneseq }
  0xf0   :  { %v407_v22 = vpack.c.bf16 %v1122_v15, %v1122_v15  ;;  %v428_v24 = vunpack.c.l.bf16 %v412_v18  ;;  %1129 = vtanh.f32 %v385_v19 }
  0xf1   :  { %455 = vadd.xlane.f32.xlu0 %v438_v56  ;;  %v446_v27 = vmul.f32 %v1392_v16, %v427_v20  ;;  %v502_v56 = vand.u32 127, %v501_v33 }
  0xf2   :  { %v1124_v21 = vpop.eup %1123  ;;  %v423_v29 = vunpack.c.l.bf16 %v407_v22  ;;  %v447_v31 = vmul.f32 %v1392_v16, %v428_v24 }
  0xf3   :  { %459 = vadd.xlane.f32.xlu1 %v440_v62  ;;  %v1126_v25 = vpop.eup %1125  ;;  %v414_v28 = vpack.c.bf16 %v1124_v21, %v1124_v21  ;;  %v525_v57 = vadd.s32 4294967288, %v502_v56 }
  0xf4   :  { %469 = vadd.xlane.f32.xlu2 %v445_v5  ;;  %v1128_v30 = vpop.eup %1127  ;;  %v415_v32 = vpack.c.bf16 %v1126_v25, %v1126_v25  ;;  %v442_v38 = vmul.f32 %v1392_v16, %v423_v29 }
  0xf5   :  { %v430_v34 = vunpack.c.l.bf16 %v414_v28  ;;  %v416_v37 = vpack.c.bf16 %v1128_v30, %v1128_v30 }
  0xf6   :  { %v1130_v36 = vpop.eup %1129  ;;  %v431_v26 = vunpack.c.l.bf16 %v415_v32 }
  0xf7   :  { %v417_v35 = vpack.c.bf16 %v1130_v36, %v1130_v36  ;;  %v449_v39 = vmul.f32 %v1392_v16, %v430_v34  ;;  %v432_v40 = vunpack.c.l.bf16 %v416_v37 }
  0xf8   :  { %v450_v41 = vmul.f32 %v1392_v16, %v431_v26 }
  0xf9   :  { %465 = vadd.xlane.f32.xlu0 %v443_v12  ;;  %v433_v42 = vunpack.c.l.bf16 %v417_v35  ;;  %v451_v43 = vmul.f32 %v1392_v16, %v432_v40  ;;  %v593_v40 = vshrl.u32 %v501_v33, 7 }
  0xfb   :  { %467 = vadd.xlane.f32.xlu1 %v444_v17  ;;  %v452_v44 = vmul.f32 %v1392_v16, %v433_v42  ;;  %1086 = vset.pattern.permute.xlu2 %v593_v40 }
  0xfc   :  { %475 = vadd.xlane.f32.xlu2 %v448_v23 }
 0x101   :  { %471 = vadd.xlane.f32.xlu0 %v446_v27 }
 0x103   :  { %473 = vadd.xlane.f32.xlu1 %v447_v31 }
 0x104   :  { %463 = vadd.xlane.f32.xlu2 %v442_v38 }
 0x109   :  { %477 = vadd.xlane.f32.xlu0 %v449_v39 }
 0x10b   :  { %479 = vadd.xlane.f32.xlu1 %v450_v41  ;;  %v600_v41 = vadd.s32 8, %v593_v40 }
 0x10c   :  { %481 = vadd.xlane.f32.xlu2 %v451_v43 }
 0x10d   :  { %1087 = vset.pattern.permute.xlu0 %v600_v41 }
 0x111   :  { %483 = vadd.xlane.f32.xlu0 %v452_v44 }
 0x124   :  { %505 = vperm.xlu1 %1085, %v503_v45  }
 0x12c   :  { %1088 = vset.pattern.permute.xlu1 %v593_v40 }
 0x15c   :  { %v454_v46 = vpop.xlane.xlu0 %453 }
 0x15d   :  { %v524_v1 = vperm.slane %v454_v46, %v502_v56 }
 0x15e   :  { %v458_v47 = vpop.xlane.xlu1 %457 }
 0x15f   :  { %v462_v48 = vpop.xlane.xlu2 %461  ;;  %v529_v63 = vperm.slane %v458_v47, %v502_v56 }
 0x160   :  { %v532_v0 = vperm.slane %v462_v48, %v502_v56 }
 0x164   :  { %v456_v49 = vpop.xlane.xlu0 %455 }
 0x165   :  { %v526_v60 = vperm.slane %v456_v49, %v525_v57 }
 0x166   :  { %v460_v50 = vpop.xlane.xlu1 %459 }
 0x167   :  { %v470_v51 = vpop.xlane.xlu2 %469  ;;  %v530_v61 = vperm.slane %v460_v50, %v525_v57  ;;  %v528_v4 = vsel %vm527_vm2, %v526_v60, %v524_v1 }
 0x168   :  { %v538_v13 = vperm.slane %v470_v51, %v502_v56 }
 0x169   :  { %v531_v2 = vsel %vm527_vm2, %v530_v61, %v529_v63 }
 0x16a   :  { %v551_v6 = vsel %vm550_vm3, %v531_v2, %v528_v4  ;;  %v100_v2 = vld [vmem:[#allocation2 + $0x8] sm:$0xf]  ;;  %v101_v4 = vld [vmem:[#allocation2 + $0xc] sm:$0xff]  }
 0x16c   :  { %v466_v52 = vpop.xlane.xlu0 %465 }
 0x16d   :  { %v535_v7 = vperm.slane %v466_v52, %v502_v56 }
 0x16e   :  { %v468_v53 = vpop.xlane.xlu1 %467 }
 0x16f   :  { %v476_v54 = vpop.xlane.xlu2 %475  ;;  %v536_v5 = vperm.slane %v468_v53, %v525_v57 }
 0x170   :  { %v542_v22 = vperm.slane %v476_v54, %v525_v57 }
 0x171   :  { %v537_v12 = vsel %vm527_vm2, %v536_v5, %v535_v7  ;;  %v98_v5 = vld [vmem:[#allocation2] sm:$0xff]  }
 0x172   :  { %v696_v7 = vunpack.c.h.bf16 %v98_v5 }
 0x174   :  { %v472_v55 = vpop.xlane.xlu0 %471 }
 0x175   :  { %v539_v10 = vperm.slane %v472_v55, %v525_v57 }
 0x176   :  { %v474_v16 = vpop.xlane.xlu1 %473 }
 0x177   :  { %v464_v58 = vpop.xlane.xlu2 %463  ;;  %v541_v18 = vperm.slane %v474_v16, %v502_v56  ;;  %v540_v20 = vsel %vm527_vm2, %v539_v10, %v538_v13  ;;  %v698_v10 = vunpack.c.l.bf16 %v101_v4  ;;  %v695_v13 = vunpack.c.l.bf16 %v98_v5 }
 0x178   :  { %v533_v62 = vperm.slane %v464_v58, %v525_v57 }
 0x179   :  { %v543_v27 = vsel %vm527_vm2, %v542_v22, %v541_v18 }
 0x17a   :  { %v534_v3 = vsel %vm527_vm2, %v533_v62, %v532_v0 }
 0x17b   :  { %v553_v8 = vsel %vm552_vm4, %v534_v3, %v551_v6  ;;  %v697_v6 = vunpack.c.l.bf16 %v100_v2 }
 0x17c   :  { %v478_v59 = vpop.xlane.xlu0 %477  ;;  %v555_v14 = vsel %vm554_vm5, %v537_v12, %v553_v8  ;;  %v103_v8 = vld [vmem:[#allocation2 + $0x14] sm:$0xff]   ;;  %v105_v12 = vld [vmem:[#allocation2 + $0x1c] sm:$0xff]  }
 0x17d   :  { %v544_v21 = vperm.slane %v478_v59, %v502_v56  ;;  %v557_v24 = vsel %vm556_vm6, %v540_v20, %v555_v14  ;;  %v107_v14 = vld [vmem:[#allocation2 + $0x24] sm:$0xff]   ;;  %v703_v20 = vunpack.c.h.bf16 %v105_v12  ;;  %v702_v22 = vunpack.c.l.bf16 %v105_v12 }
 0x17e   :  { %v480_v9 = vpop.xlane.xlu1 %479  ;;  %v559_v29 = vsel %vm558_vm7, %v543_v27, %v557_v24  ;;  %v1058_v24 = vld [vmem:[#allocation8 + $0x30] sm:$0xff] }
 0x17f   :  { %v545_v15 = vperm.slane %v480_v9, %v525_v57  ;;  %v482_v17 = vpop.xlane.xlu2 %481 }
 0x180   :  { %v547_v23 = vperm.slane %v482_v17, %v502_v56  ;;  %v1059_v17 = vld [vmem:[#allocation8 + $0x38] sm:$0xff] }
 0x181   :  { %v546_v25 = vsel %vm527_vm2, %v545_v15, %v544_v21  ;;  %v701_v15 = vunpack.c.h.bf16 %v103_v8  ;;  %884 = vmatpush.bf16.msra.mxu2 %v1059_v17 }
 0x182   :  { %v561_v31 = vsel %vm560_vm8, %v546_v25, %v559_v29 }
 0x184   :  { %v484_v11 = vpop.xlane.xlu0 %483 }
 0x185   :  { %v548_v19 = vperm.slane %v484_v11, %v525_v57  ;;  %v699_v11 = vunpack.c.h.bf16 %v101_v4  ;;  %885 = vmatpush.bf16.msra.mxu2 %v1058_v24 }
 0x187   :  { %v549_v28 = vsel %vm527_vm2, %v548_v19, %v547_v23  ;;  %v700_v19 = vunpack.c.l.bf16 %v103_v8 }
 0x188   :  { %v563_v32 = vsel %vm562_vm9, %v549_v28, %v561_v31  ;;  %v704_v28 = vunpack.c.l.bf16 %v107_v14 }
 0x196   :  { %v506_v30 = vpop.permute.xlu1 %505 }
 0x197   :  { %vm507_vm11 = vcmp.lt.s32.totalorder %v502_v56, %v506_v30 }
 0x198   :  { %v565_v34 = vsel %vm507_vm11, %v563_v32, -inf }
 0x199   :  { %v567_v36 = vsel %vm566_vm10, %v565_v34, -inf }
 0x19a   :  { %568 = vmax.xlane.f32.xlu2 %v567_v36 }
 0x20d   :  { %v569_v37 = vpop.xlane.xlu2 %568 }
 0x20e   :  { %v570_v38 = vsub.f32 %v565_v34, %v569_v37 }
 0x210   :  { %v571_v26 = vmul.f32 1.442695, %v570_v38 }
 0x212   :  { %1131 = vpow2.f32 %v571_v26 }
 0x218   :  { %v1132_v35 = vpop.eup %1131 }
 0x219   :  { %v573_v39 = vsel %vm566_vm10, %v1132_v35, 0.0 }
 0x21a   :  { %574 = vadd.xlane.f32.xlu0 %v573_v39 }
 0x28d   :  { %v575_v42 = vpop.xlane.xlu0 %574 }
 0x28e   :  { %1133 = vrcp.f32 %v575_v42  ;;  %v587_v46 = vand.u32 2147483648, %v575_v42  ;;  %v585_v48 = vand.u32 2147483647, %v575_v42  ;;  %vm581_vm13 = vweird.f32 %v575_v42 }
 0x290   :  { %v588_v50 = vor.u32 1.1754944e-38, %v587_v46  ;;  %vm586_vm15 = vcmp.eq.f32.partialorder %v585_v48, 8.507059e+37  ;;  %v705_v46 = vunpack.c.h.bf16 %v107_v14  ;;  %v1057_v48 = vld [vmem:[#allocation8 + $0x28] sm:$0xff] }
 0x291   :  { %886 = vmatpush.bf16.msra.mxu2 %v1057_v48 }
 0x294   :  { %v1134_v43 = vpop.eup %1133 }
 0x295   :  { %v577_v44 = vmul.f32 %v1134_v43, %v575_v42  ;;  %vm582_vm12 = vweird.f32 %v1134_v43  ;;  %v110_v42 = vld [vmem:[#allocation2 + $0x30] sm:$0xff]  }
 0x296   :  { %vm583_vm14 = vmor %vm581_vm13, %vm582_vm12 }
 0x297   :  { %v578_v45 = vsub.f32 1.0, %v577_v44 }
 0x299   :  { %v579_v47 = vmul.f32 %v1134_v43, %v578_v45 }
 0x29b   :  { %v580_v49 = vadd.f32 %v1134_v43, %v579_v47 }
 0x29d   :  { %v584_v51 = vsel %vm583_vm14, %v1134_v43, %v580_v49 }
 0x29e   :  { %v589_v52 = vsel %vm586_vm15, %v588_v50, %v584_v51  ;;  %v707_v50 = vunpack.c.l.bf16 %v110_v42  ;;  %v708_v51 = vunpack.c.h.bf16 %v110_v42 }
 0x29f   :  { %v590_v53 = vmul.f32 %v1132_v35, %v589_v52 }
 0x2a1   :  { %898 = vst.msk [vmem:[#allocation11] sm:$0xff] %vm566_vm10, %v590_v53  ;;  %v604_v54 = vperm.slane %v590_v53, 1  ;;  %v591_v55 = vperm.slane %v590_v53, 0  ;;  %v617_v33 = vperm.slane %v590_v53, 2  ;;  %v643_v56 = vperm.slane %v590_v53, 4 }
 0x2a2   :  { %v630_v57 = vperm.slane %v590_v53, 3  ;;  %v669_v16 = vperm.slane %v590_v53, 6  ;;  %v656_v58 = vperm.slane %v590_v53, 5  ;;  %v682_v59 = vperm.slane %v590_v53, 7  ;;  %920 = dma.vmem_to_hbm [thread:$0]  %s916_s21, 128, %s918_s19, [#allocation12]  }
 0x2a3   :  { %609 = vperm.xlu1 %1088, %v604_v54   ;;  %602 = vperm.xlu0 %1087, %v591_v55  }
 0x2a4   :  { %596 = vperm.xlu2 %1086, %v591_v55  }
 0x2ab   :  { %622 = vperm.xlu1 %1088, %v617_v33   ;;  %654 = vperm.xlu0 %1087, %v643_v56  }
 0x2ac   :  { %1089 = vset.pattern.permute.xlu2 %v600_v41 }
 0x2b3   :  { %635 = vperm.xlu1 %1088, %v630_v57   ;;  %1092 = vset.pattern.permute.xlu0 %v593_v40 }
 0x2b4   :  { %615 = vperm.xlu2 %1089, %v604_v54   ;;  %v1056_v54 = vld [vmem:[#allocation8 + $0x20] sm:$0xff] }
 0x2b5   :  { %887 = vmatpush.bf16.msra.mxu2 %v1056_v54 }
 0x2bb   :  { %648 = vperm.xlu1 %1088, %v643_v56   ;;  %674 = vperm.xlu0 %1092, %v669_v16  }
 0x2bc   :  { %628 = vperm.xlu2 %1089, %v617_v33  }
 0x2c3   :  { %1091 = vset.pattern.permute.xlu1 %v600_v41  ;;  %1095 = vset.pattern.permute.xlu0 %v600_v41 }
 0x2c4   :  { %641 = vperm.xlu2 %1089, %v630_v57  }
 0x2cb   :  { %667 = vperm.xlu1 %1091, %v656_v58  }
 0x2cc   :  { %1090 = vset.pattern.permute.xlu2 %v593_v40 }
 0x2d3   :  { %1094 = vset.pattern.permute.xlu1 %v593_v40  ;;  %v109_v40 = vld [vmem:[#allocation2 + $0x2c] sm:$0xf] }
 0x2d4   :  { %661 = vperm.xlu2 %1090, %v656_v58   ;;  %v706_v47 = vunpack.c.l.bf16 %v109_v40 }
 0x2db   :  { %687 = vperm.xlu1 %1094, %v682_v59  }
 0x2dc   :  { %1093 = vset.pattern.permute.xlu2 %v600_v41 }
 0x2e4   :  { %680 = vperm.xlu2 %1093, %v669_v16  }
 0x2ec   :  { %693 = vperm.xlu2 %1093, %v682_v59  }
 0x2fe   :  { %v597_v61 = vpop.permute.xlu2 %596 }
 0x2ff   :  { %v711_v29 = vmul.f32 %v695_v13, %v597_v61 }
 0x30e   :  { %v616_v63 = vpop.permute.xlu2 %615 }
 0x30f   :  { %v714_v25 = vmul.f32 %v698_v10, %v616_v63 }
 0x315   :  { %v610_v62 = vpop.permute.xlu1 %609  ;;  %v603_v3 = vpop.permute.xlu0 %602 }
 0x316   :  { %v629_v0 = vpop.permute.xlu2 %628  ;;  %v713_v18 = vmul.f32 %v697_v6, %v610_v62  ;;  %v712_v21 = vmul.f32 %v696_v7, %v603_v3 }
 0x317   :  { %v716_v34 = vmul.f32 %v700_v19, %v629_v0  ;;  %v113_v19 = vld [vmem:[#allocation2 + $0x38] sm:$0xff]  }
 0x318   :  { %v734_v32 = vadd.f32 %v714_v25, %v713_v18  ;;  %v727_v37 = vadd.f32 %v712_v21, %v711_v29  ;;  %v1053_v21 = vld [vmem:[#allocation8 + $0x8] sm:$0xff]  ;;  %v709_v29 = vunpack.c.l.bf16 %v113_v19 }
 0x31a   :  { %v735_v43 = vrot.slane %v734_v32, 4  ;;  %v728_v45 = vrot.slane %v727_v37, 4 }
 0x31c   :  { %v736_v55 = vadd.f32 %v735_v43, %v734_v32  ;;  %v729_v57 = vadd.f32 %v728_v45, %v727_v37 }
 0x31d   :  { %v623_v60 = vpop.permute.xlu1 %622  ;;  %v655_v30 = vpop.permute.xlu0 %654 }
 0x31e   :  { %v642_v9 = vpop.permute.xlu2 %641  ;;  %v715_v27 = vmul.f32 %v699_v11, %v623_v60  ;;  %v720_v39 = vmul.f32 %v704_v28, %v655_v30  ;;  %v737_v2 = vrot.slane %v736_v55, 2  ;;  %v730_v5 = vrot.slane %v729_v57, 2  ;;  %v1054_v11 = vld [vmem:[#allocation8 + $0x10] sm:$0xff] }
 0x31f   :  { %v718_v38 = vmul.f32 %v702_v22, %v642_v9  ;;  %v710_v28 = vunpack.c.h.bf16 %v113_v19 }
 0x320   :  { %v741_v35 = vadd.f32 %v716_v34, %v715_v27  ;;  %v738_v12 = vadd.f32 %v737_v2, %v736_v55  ;;  %v1052_v34 = vld [vmem:[#allocation8] sm:$0xff] }
 0x322   :  { %v742_v49 = vrot.slane %v741_v35, 4  ;;  %v739_v22 = vrot.slane %v738_v12, 1 }
 0x324   :  { %v743_v61 = vadd.f32 %v742_v49, %v741_v35 }
 0x325   :  { %v636_v1 = vpop.permute.xlu1 %635 }
 0x326   :  { %v717_v31 = vmul.f32 %v701_v15, %v636_v1  ;;  %v1055_v1 = vld [vmem:[#allocation8 + $0x18] sm:$0xff]  ;;  %v744_v7 = vrot.slane %v743_v61, 2  ;;  %v731_v15 = vadd.f32 %v730_v5, %v729_v57 }
 0x327   :  { %888 = vmatpush.bf16.msra.mxu2 %v1055_v1 }
 0x328   :  { %v748_v41 = vadd.f32 %v718_v38, %v717_v31  ;;  %v745_v18 = vadd.f32 %v744_v7, %v743_v61  ;;  %v732_v25 = vrot.slane %v731_v15, 1 }
 0x32a   :  { %v749_v52 = vrot.slane %v748_v41, 4  ;;  %v746_v30 = vrot.slane %v745_v18, 1  ;;  %v733_v35 = vadd.f32 %v732_v25, %v731_v15 }
 0x32b   :  { %889 = vmatpush.bf16.msra.mxu2 %v1054_v11 }
 0x32c   :  { %v750_v60 = vadd.f32 %v749_v52, %v748_v41  ;;  %v747_v42 = vadd.f32 %v746_v30, %v745_v18  ;;  %v783_v48 = vpack.c.bf16 %v733_v35, %v733_v35 }
 0x32d   :  { %v649_v23 = vpop.permute.xlu1 %648  ;;  %v675_v53 = vpop.permute.xlu0 %674 }
 0x32e   :  { %v719_v36 = vmul.f32 %v703_v20, %v649_v23  ;;  %v662_v26 = vpop.permute.xlu2 %661  ;;  %v723_v62 = vmul.f32 %v707_v50, %v675_v53  ;;  %v751_v9 = vrot.slane %v750_v60, 2 }
 0x32f   :  { %v721_v16 = vmul.f32 %v705_v46, %v662_v26  ;;  %890 = vmatpush.bf16.msra.mxu2 %v1053_v21 }
 0x330   :  { %v755_v44 = vadd.f32 %v720_v39, %v719_v36  ;;  %v752_v20 = vadd.f32 %v751_v9, %v750_v60  ;;  %v740_v36 = vadd.f32 %v739_v22, %v738_v12 }
 0x332   :  { %v756_v33 = vrot.slane %v755_v44, 4  ;;  %v753_v32 = vrot.slane %v752_v20, 1 }
 0x333   :  { %891 = vmatpush.bf16.msra.mxu2 %v1052_v34 }
 0x334   :  { %v757_v3 = vadd.f32 %v756_v33, %v755_v44  ;;  %v754_v43 = vadd.f32 %v753_v32, %v752_v20 }
 0x336   :  { %v758_v13 = vrot.slane %v757_v3, 2  ;;  %v786_v52 = vpack.c.bf16 %v754_v43, %v754_v43 }
 0x338   :  { %v759_v23 = vadd.f32 %v758_v13, %v757_v3  ;;  %v1098_v13 = vld [vmem:[%s1459_s8] ss:$0 sm:$0xff] }
 0x33a   :  { %v760_v37 = vrot.slane %v759_v23, 1 }
 0x33c   :  { %v761_v45 = vadd.f32 %v760_v37, %v759_v23 }
 0x33d   :  { %v668_v56 = vpop.permute.xlu1 %667 }
 0x33e   :  { %v722_v58 = vmul.f32 %v706_v47, %v668_v56  ;;  %v681_v59 = vpop.permute.xlu2 %680  ;;  %v784_v47 = vpack.c.bf16 %v740_v36, %v740_v36  ;;  %v787_v54 = vpack.c.bf16 %v761_v45, %v761_v45  ;;  %v819_v56 = vunpack.c.l.b16 %v783_v48 }
 0x33f   :  { %v724_v63 = vmul.f32 %v708_v51, %v681_v59  ;;  %v785_v51 = vpack.c.bf16 %v747_v42, %v747_v42  ;;  %v822_v59 = vunpack.c.l.b16 %v786_v52 }
 0x340   :  { %v762_v0 = vadd.f32 %v722_v58, %v721_v16  ;;  %v820_v33 = vunpack.c.l.b16 %v784_v47 }
 0x341   :  { %v769_v4 = vadd.f32 %v724_v63, %v723_v62  ;;  %v821_v58 = vunpack.c.l.b16 %v785_v51  ;;  %v823_v62 = vunpack.c.l.b16 %v787_v54 }
 0x342   :  { %v763_v6 = vrot.slane %v762_v0, 4  ;;  %v827_v60 = vsel %vm550_vm3, %v820_v33, %v819_v56 }
 0x343   :  { %v770_v8 = vrot.slane %v769_v4, 4  ;;  %v828_v2 = vsel %vm552_vm4, %v821_v58, %v827_v60 }
 0x344   :  { %v764_v10 = vadd.f32 %v763_v6, %v762_v0 }
 0x345   :  { %v771_v14 = vadd.f32 %v770_v8, %v769_v4  ;;  %v829_v4 = vsel %vm554_vm5, %v822_v59, %v828_v2 }
 0x346   :  { %v765_v17 = vrot.slane %v764_v10, 2  ;;  %v694_v31 = vpop.permute.xlu2 %693  ;;  %v830_v6 = vsel %vm556_vm6, %v823_v62, %v829_v4 }
 0x347   :  { %v772_v24 = vrot.slane %v771_v14, 2  ;;  %v726_v40 = vmul.f32 %v710_v28, %v694_v31 }
 0x348   :  { %v766_v27 = vadd.f32 %v765_v17, %v764_v10 }
 0x349   :  { %v773_v38 = vadd.f32 %v772_v24, %v771_v14 }
 0x34a   :  { %v767_v39 = vrot.slane %v766_v27, 1 }
 0x34b   :  { %v774_v46 = vrot.slane %v773_v38, 1 }
 0x34c   :  { %v768_v49 = vadd.f32 %v767_v39, %v766_v27 }
 0x34d   :  { %v688_v26 = vpop.permute.xlu1 %687  ;;  %v775_v55 = vadd.f32 %v774_v46, %v773_v38 }
 0x34e   :  { %v725_v41 = vmul.f32 %v709_v29, %v688_v26  ;;  %v788_v57 = vpack.c.bf16 %v768_v49, %v768_v49 }
 0x34f   :  { %v789_v63 = vpack.c.bf16 %v775_v55, %v775_v55 }
 0x350   :  { %v776_v44 = vadd.f32 %v726_v40, %v725_v41  ;;  %v824_v0 = vunpack.c.l.b16 %v788_v57 }
 0x351   :  { %v825_v5 = vunpack.c.l.b16 %v789_v63 }
 0x352   :  { %v777_v50 = vrot.slane %v776_v44, 4  ;;  %v831_v8 = vsel %vm558_vm7, %v824_v0, %v830_v6 }
 0x353   :  { %v832_v10 = vsel %vm560_vm8, %v825_v5, %v831_v8 }
 0x354   :  { %v778_v53 = vadd.f32 %v777_v50, %v776_v44 }
 0x356   :  { %v779_v16 = vrot.slane %v778_v53, 2 }
 0x358   :  { %v780_v61 = vadd.f32 %v779_v16, %v778_v53 }
 0x35a   :  { %v781_v1 = vrot.slane %v780_v61, 1 }
 0x35c   :  { %v782_v3 = vadd.f32 %v781_v1, %v780_v61 }
 0x35e   :  { %v790_v7 = vpack.c.bf16 %v782_v3, %v782_v3 }
 0x360   :  { %v826_v9 = vunpack.c.l.b16 %v790_v7 }
 0x362   :  { %v833_v11 = vsel %vm562_vm9, %v826_v9, %v832_v10 }
 0x363   :  { %v834_v12 = vpack.c.b16 %v833_v11, %v833_v11 }
 0x365   :  { %892 = vmatmul.bf16.vlgmr.msra.gmra.mxu2 %v834_v12 }
 0x3e8   :  { %v893_v14 = vpop.f32.mrf.mxu2 }
 0x3e9   :  { %v894_v15 = vadd.f32 %v1098_v13, %v893_v14 }
 0x3eb   :  { %897 = vst [vmem:[#allocation10] sm:$0xff] %v894_v15 }
 0x3ec   :  { %909 = dma.vmem_to_hbm [thread:$0]  %s905_s25, 128, %s907_s27, [#allocation4]  }
 0x3f0   :  { %v895_v17 = vpop.f32.mrf.mxu2 }
 0x3f1   :  { %1285 = dma.done.wait [#allocation4], 128  }
 0x3f2   :  { %1286 = vsyncadd [#allocation4], 4294967168 }
 0x3f3   :  { %1287 = dma.done.wait [#allocation12], 128  }
 0x3f4   :  { %1288 = vsyncadd [#allocation12], 4294967168 }
 0x3f5   :  { %929 = vsyncpa [#allocation3], 1 }
 0x3f6   :  { %930 = vsyncpa [#allocation6], 1 }
 0x3f7   :  { %931 = vsyncpa [#allocation9], 1 }
 0x3f8   :  { %932 = vsyncpa [#allocation4], 1 }
 0x3f9   :  { %933 = vsyncpa [#allocation12], 1 }

</bundles_post_ra>
